<compile_context>
chip_gen: v7x
topology: tpu7x:2x2x1
jax: 0.10.0
libtpu: 0.0.40
codegen_flags: <defaults>
</compile_context>

<pallas_src>
import functools

import jax
import jax.numpy as jnp
import numpy as np
from jax.experimental import pallas as pl
from jax.experimental.pallas import tpu as pltpu


def _conv3x3_kernel(x_ref, w_ref, m_ref, o_ref, *, width):
    """3x3 same-padding conv (no bias) on a lane-flattened spatial plane.

    x_ref: (1, C_in, HW)   one image; channels on sublanes, spatial on lanes
    w_ref: (C_out, 9*C_in) weights, columns ordered (kh, kw, c_in)
    m_ref: (9, HW)         per-tap validity masks (1.0 inside, 0.0 at padding)
    o_ref: (1, C_out, HW)
    """
    _, c_in, hw = x_ref.shape
    x = x_ref[0]                                            # (C_in, HW)
    masks = m_ref[...]                                      # (9, HW), load once

    taps = []
    t = 0
    for kh in range(3):
        for kw in range(3):
            d = (kh - 1) * width + (kw - 1)                 # flat-index offset
            if d == 0:
                tap = x                                     # centre tap: always valid
            else:
                # rolled[p] = x[(p + d) mod HW]; the mask kills wrapped /
                # out-of-bounds (zero-padding) reads.
                rolled = pltpu.roll(x, shift=(-d) % hw, axis=1)
                tap = rolled * masks[t:t + 1, :]            # (C_in,HW) * (1,HW)
            taps.append(tap)
            t += 1

    xs = jnp.concatenate(taps, axis=0)                      # (9*C_in, HW)
    acc = jnp.dot(w_ref[...], xs, preferred_element_type=jnp.float32)
    o_ref[0] = acc.astype(o_ref.dtype)                      # (C_out, HW)


def upsample_pallas(x_nchw, weight, scale):
    """x_nchw: (N, C, H, W); weight: (C*scale^2, C, 3, 3); returns (N, C, H*s, W*s)."""
    N, C, H, W = x_nchw.shape
    C_out = C * scale * scale
    assert weight.shape == (C_out, C, 3, 3)
    HW = H * W

    # Lane-dense flattening (no transpose needed: NCHW is channels-major).
    x_flat = x_nchw.reshape(N, C, HW)

    # Weight as (C_out, 9*C_in); column order (kh, kw, c_in) matches the tap
    # stacking order inside the kernel.
    w_mat = jnp.transpose(weight, (0, 2, 3, 1)).reshape(C_out, 9 * C)
    w_mat = w_mat.astype(x_nchw.dtype)

    # Per-tap boundary masks over the flattened spatial axis (host constants:
    # keeps all int div/mod out of the kernel and off the VPU).
    hh, ww = np.meshgrid(np.arange(H), np.arange(W), indexing="ij")
    mask_list = []
    for kh in range(3):
        for kw in range(3):
            dh, dw = kh - 1, kw - 1
            valid = ((hh + dh >= 0) & (hh + dh < H) &
                     (ww + dw >= 0) & (ww + dw < W))
            mask_list.append(valid.reshape(-1))
    masks = jnp.asarray(np.stack(mask_list), dtype=x_nchw.dtype)   # (9, HW)

    grid_spec = pltpu.PrefetchScalarGridSpec(
        num_scalar_prefetch=0,
        grid=(N,),
        in_specs=[
            pl.BlockSpec((1, C, HW), lambda n: (n, 0, 0)),
            pl.BlockSpec((C_out, 9 * C), lambda n: (0, 0)),   # resident across grid
            pl.BlockSpec((9, HW), lambda n: (0, 0)),          # resident across grid
        ],
        out_specs=pl.BlockSpec((1, C_out, HW), lambda n: (n, 0, 0)),
    )

    conv_flat = pl.pallas_call(
        functools.partial(_conv3x3_kernel, width=W),
        out_shape=jax.ShapeDtypeStruct((N, C_out, HW), x_nchw.dtype),
        grid_spec=grid_spec,
        compiler_params=pltpu.CompilerParams(
            dimension_semantics=("parallel",)),
    )(x_flat, w_mat, masks)

    # PixelShuffle(scale): out[n, c, h*s+i, w*s+j] = conv[n, c*s*s + i*s + j, h, w].
    # Pure permutation -> wrapper-side layout plumbing.
    y = conv_flat.reshape(N, C, scale, scale, H, W)
    y = jnp.transpose(y, (0, 1, 4, 2, 5, 3))
    return y.reshape(N, C, H * scale, W * scale)


def upsample_ref(x_nchw, weight, scale):
    """Pure-JAX reference (conv + pixel shuffle) for correctness checking."""
    conv = jax.lax.conv_general_dilated(
        x_nchw, weight, window_strides=(1, 1), padding=((1, 1), (1, 1)),
        dimension_numbers=("NCHW", "OIHW", "NCHW"))
    N, C_out, H, W = conv.shape
    C = C_out // (scale * scale)
    y = conv.reshape(N, C, scale, scale, H, W)
    y = jnp.transpose(y, (0, 1, 4, 2, 5, 3))
    return y.reshape(N, C, H * scale, W * scale)


if __name__ == "__main__":
    # Small shapes consistent with the module: n_feat=4, scale=2, 16x16 spatial.
    N, n_feat, H, W = 2, 4, 16, 16
    scale = 2
    C_out = n_feat * scale * scale          # 16

    key = jax.random.PRNGKey(0)
    kx, kw = jax.random.split(key)
    x = jax.random.normal(kx, (N, n_feat, H, W), jnp.float32)
    weight = 0.1 * jax.random.normal(kw, (C_out, n_feat, 3, 3), jnp.float32)

    out = upsample_pallas(x, weight, scale)
    out = jax.block_until_ready(out)

    ref = upsample_ref(x, weight, scale)
    assert out.shape == (N, n_feat, H * scale, W * scale)
    max_err = float(jnp.max(jnp.abs(out - ref)))
    assert jnp.allclose(out, ref, atol=1e-4, rtol=1e-4), max_err

    print("KERNEL_OK")
</pallas_src>

<mosaic_0001>
module attributes {stable_mosaic.version = 11 : i64} {
  func.func @_conv3x3_kernel(%arg0: i32, %arg1: memref<1x4x256xf32, #tpu.memory_space<vmem>>, %arg2: memref<16x36xf32, #tpu.memory_space<vmem>>, %arg3: memref<9x256xf32, #tpu.memory_space<vmem>>, %arg4: memref<1x16x256xf32, #tpu.memory_space<vmem>>) attributes {dimension_semantics = [#tpu.dimension_semantics<parallel>], iteration_bounds = array<i64: 2>, scalar_prefetch = 0 : i64, scratch_operands = 0 : i64, tpu.core_type = #tpu.core_type<tc>, window_params = [{transform_indices = @transform_0, window_bounds = array<i64: 1, 4, 256>}, {pipeline_mode = #tpu.pipeline_mode<synchronous>, transform_indices = @transform_1, window_bounds = array<i64: 16, 36>}, {pipeline_mode = #tpu.pipeline_mode<synchronous>, transform_indices = @transform_2, window_bounds = array<i64: 9, 256>}, {transform_indices = @transform_3, window_bounds = array<i64: 1, 16, 256>}]} {
    %c0 = arith.constant 0 : index
    %c0_0 = arith.constant 0 : index
    %c0_1 = arith.constant 0 : index
    %0 = vector.load %arg1[%c0, %c0_0, %c0_1] : memref<1x4x256xf32, #tpu.memory_space<vmem>>, vector<1x4x256xf32>
    %1 = vector.shape_cast %0 : vector<1x4x256xf32> to vector<4x256xf32>
    %c0_2 = arith.constant 0 : index
    %c0_3 = arith.constant 0 : index
    %2 = vector.load %arg3[%c0_2, %c0_3] : memref<9x256xf32, #tpu.memory_space<vmem>>, vector<9x256xf32>
    %c17_i32 = arith.constant 17 : i32
    %3 = tpu.dynamic_rotate %1 by %c17_i32 dim 1 : vector<4x256xf32>, i32 -> vector<4x256xf32>
    %4 = vector.extract_strided_slice %2 {offsets = [0, 0], sizes = [1, 256], strides = [1, 1]} : vector<9x256xf32> to vector<1x256xf32>
    %5 = vector.broadcast %4 : vector<1x256xf32> to vector<4x256xf32>
    %6 = arith.mulf %3, %5 : vector<4x256xf32>
    %c16_i32 = arith.constant 16 : i32
    %7 = tpu.dynamic_rotate %1 by %c16_i32 dim 1 : vector<4x256xf32>, i32 -> vector<4x256xf32>
    %8 = vector.extract_strided_slice %2 {offsets = [1, 0], sizes = [1, 256], strides = [1, 1]} : vector<9x256xf32> to vector<1x256xf32>
    %9 = vector.broadcast %8 : vector<1x256xf32> to vector<4x256xf32>
    %10 = arith.mulf %7, %9 : vector<4x256xf32>
    %c15_i32 = arith.constant 15 : i32
    %11 = tpu.dynamic_rotate %1 by %c15_i32 dim 1 : vector<4x256xf32>, i32 -> vector<4x256xf32>
    %12 = vector.extract_strided_slice %2 {offsets = [2, 0], sizes = [1, 256], strides = [1, 1]} : vector<9x256xf32> to vector<1x256xf32>
    %13 = vector.broadcast %12 : vector<1x256xf32> to vector<4x256xf32>
    %14 = arith.mulf %11, %13 : vector<4x256xf32>
    %c1_i32 = arith.constant 1 : i32
    %15 = tpu.dynamic_rotate %1 by %c1_i32 dim 1 : vector<4x256xf32>, i32 -> vector<4x256xf32>
    %16 = vector.extract_strided_slice %2 {offsets = [3, 0], sizes = [1, 256], strides = [1, 1]} : vector<9x256xf32> to vector<1x256xf32>
    %17 = vector.broadcast %16 : vector<1x256xf32> to vector<4x256xf32>
    %18 = arith.mulf %15, %17 : vector<4x256xf32>
    %c255_i32 = arith.constant 255 : i32
    %19 = tpu.dynamic_rotate %1 by %c255_i32 dim 1 : vector<4x256xf32>, i32 -> vector<4x256xf32>
    %20 = vector.extract_strided_slice %2 {offsets = [5, 0], sizes = [1, 256], strides = [1, 1]} : vector<9x256xf32> to vector<1x256xf32>
    %21 = vector.broadcast %20 : vector<1x256xf32> to vector<4x256xf32>
    %22 = arith.mulf %19, %21 : vector<4x256xf32>
    %c241_i32 = arith.constant 241 : i32
    %23 = tpu.dynamic_rotate %1 by %c241_i32 dim 1 : vector<4x256xf32>, i32 -> vector<4x256xf32>
    %24 = vector.extract_strided_slice %2 {offsets = [6, 0], sizes = [1, 256], strides = [1, 1]} : vector<9x256xf32> to vector<1x256xf32>
    %25 = vector.broadcast %24 : vector<1x256xf32> to vector<4x256xf32>
    %26 = arith.mulf %23, %25 : vector<4x256xf32>
    %c240_i32 = arith.constant 240 : i32
    %27 = tpu.dynamic_rotate %1 by %c240_i32 dim 1 : vector<4x256xf32>, i32 -> vector<4x256xf32>
    %28 = vector.extract_strided_slice %2 {offsets = [7, 0], sizes = [1, 256], strides = [1, 1]} : vector<9x256xf32> to vector<1x256xf32>
    %29 = vector.broadcast %28 : vector<1x256xf32> to vector<4x256xf32>
    %30 = arith.mulf %27, %29 : vector<4x256xf32>
    %c239_i32 = arith.constant 239 : i32
    %31 = tpu.dynamic_rotate %1 by %c239_i32 dim 1 : vector<4x256xf32>, i32 -> vector<4x256xf32>
    %32 = vector.extract_strided_slice %2 {offsets = [8, 0], sizes = [1, 256], strides = [1, 1]} : vector<9x256xf32> to vector<1x256xf32>
    %33 = vector.broadcast %32 : vector<1x256xf32> to vector<4x256xf32>
    %34 = arith.mulf %31, %33 : vector<4x256xf32>
    %35 = tpu.concatenate %6, %10, %14, %18, %1, %22, %26, %30, %34 in 0 : vector<4x256xf32>, vector<4x256xf32>, vector<4x256xf32>, vector<4x256xf32>, vector<4x256xf32>, vector<4x256xf32>, vector<4x256xf32>, vector<4x256xf32>, vector<4x256xf32> -> vector<36x256xf32>
    %c0_4 = arith.constant 0 : index
    %c0_5 = arith.constant 0 : index
    %36 = vector.load %arg2[%c0_4, %c0_5] : memref<16x36xf32, #tpu.memory_space<vmem>>, vector<16x36xf32>
    %cst = arith.constant dense<0.000000e+00> : vector<16x256xf32>
    %37 = tpu.matmul %36, %35, %cst {dimension_numbers = #tpu.dot_dimension_numbers<[1], [0], [0], [1], [0, 0, 1, 1], [], []>} : vector<16x36xf32>, vector<36x256xf32>, vector<16x256xf32> -> vector<16x256xf32>
    %c0_6 = arith.constant 0 : index
    %c0_7 = arith.constant 0 : index
    %c0_8 = arith.constant 0 : index
    %38 = vector.load %arg4[%c0_6, %c0_7, %c0_8] : memref<1x16x256xf32, #tpu.memory_space<vmem>>, vector<1x16x256xf32>
    %39 = vector.shape_cast %38 : vector<1x16x256xf32> to vector<16x256xf32>
    %40 = vector.shape_cast %37 : vector<16x256xf32> to vector<1x16x256xf32>
    tpu.vector_store %arg4[%c0_6, %c0_7, %c0_8], %40 {strides = array<i32>} : memref<1x16x256xf32, #tpu.memory_space<vmem>>, vector<1x16x256xf32>,
    return
  }
  func.func @transform_0(%arg0: i32) -> (i32, i32, i32) {
    %c0_i32 = arith.constant 0 : i32
    %c0_i32_0 = arith.constant 0 : i32
    %c0_i32_1 = arith.constant 0 : i32
    return %arg0, %c0_i32, %c0_i32_0 : i32, i32, i32
  }
  func.func @transform_1(%arg0: i32) -> (i32, i32) {
    %c0_i32 = arith.constant 0 : i32
    %c0_i32_0 = arith.constant 0 : i32
    %c0_i32_1 = arith.constant 0 : i32
    return %c0_i32, %c0_i32_0 : i32, i32
  }
  func.func @transform_2(%arg0: i32) -> (i32, i32) {
    %c0_i32 = arith.constant 0 : i32
    %c0_i32_0 = arith.constant 0 : i32
    %c0_i32_1 = arith.constant 0 : i32
    return %c0_i32, %c0_i32_0 : i32, i32
  }
  func.func @transform_3(%arg0: i32) -> (i32, i32, i32) {
    %c0_i32 = arith.constant 0 : i32
    %c0_i32_0 = arith.constant 0 : i32
    %c0_i32_1 = arith.constant 0 : i32
    return %arg0, %c0_i32, %c0_i32_0 : i32, i32, i32
  }
}

</mosaic_0001>

<bundles_post_ra>
// kernel: tpu_custom_call.1
= control target key start
LH: loop header
LB: loop body
LE: loop exit
PB: predicated region body
PF: predicated region fallthrough
CT: control target
= control target key end

     0   :  { %8 = vsyncpa [#allocation3], 0  ;;  %s1231_s0 = inlined_call_operand.hbm [shape: f32[2,4,256], index: 0, kind: input, shape index: {}]   ;;  %s1232_s1 = inlined_call_operand.hbm [shape: f32[16,36], index: 1, kind: input, shape index: {}]   ;;  %s1233_s2 = inlined_call_operand.hbm [shape: f32[9,256], index: 2, kind: input, shape index: {}]   ;;  %s1234_s3 = inlined_call_operand.hbm [shape: f32[2,16,256], index: 3, kind: output, shape index: {}]  }
   0x1   :  { %10 = vsyncpa [#allocation3 + $0x1], 0 }
   0x2   :  { %11 = vsyncpa [#allocation6], 0 }
   0x3   :  { %12 = vsyncpa [#allocation4], 0 }
   0x4   :  { %14 = vsyncpa [#allocation4 + $0x1], 0  ;;  %s915_s12 = smov 0   ;;  %s917_s13 = smov 0  }
   0x5   :  { %s919_s14 = smov 0   ;;  %s921_s15 = smov 0  }
   0x6 LB: > { %s936_s16 = sadd.s32 4294967295, %s875_s15   ;;  %s597_s17 = sadd.s32 4294967294, %s875_s15   ;;  %s875_s15 = sphi %s921_s15, %s1254_s15   ;;  %s871_s14 = sphi %s919_s14, %s1253_s14   ;;  %s867_s13 = sphi %s917_s13, %s1252_s13   ;;  %s863_s12 = sphi %s915_s12, %s1251_s12  }
   0x7   : > { %p40_p0 = scmp.ne.s32.totalorder %s867_s13, %s863_s12  ;;  %p1235_p1 = scmp.eq.s32.totalorder %s936_s16, 0 }
   0x8   : > { %p112_p3 = scmp.eq.s32.totalorder %s597_s17, 1  ;;  %p598_p5 = scmp.ge.s32.totalorder %s875_s15, 1 }
   0x9   : > { %p945_p4 = por %p1235_p1, %p40_p0  ;;  %p119_p7 = scmp.lt.s32.totalorder %s875_s15, 3 }
   0xa   : > { %p950_p6 = por %p112_p3, %p40_p0  ;;  %s877_s21 = smov [#allocation5]  }
   0xb   : > { %s1238_s18 = scalar_select %p945_p4, 1, 0 }
   0xc   : > { %s1239_s19 = scalar_select %p950_p6, 1, 0 }
   0xd   : > { %p955_p8 = pnand %p598_p5, %p119_p7  ;;  %s131_s22 = sshll.u32 %s877_s21, 4  ;;  %s959_s22 = int_to_ptr.vmem [resolvable:$true] %s131_s22 }
   0xe   : > { %s878_s24 = smov [#allocation7]   ;;  %s719_s28 = scalar_lea.hbm %s1232_s1, 256 }
   0xf   : > { %p649_p9 = pneg %p955_p8  ;;  %s144_s25 = sshll.u32 %s878_s24, 4  ;;  %s970_s25 = int_to_ptr.vmem [resolvable:$true] %s144_s25 }
  0x10   : > { %p720_p12 = scmp.ne.s32.totalorder %s1232_s1, %s719_s28  ;;  %p726_p5 = scmp.lt.u32.totalorder %s719_s28, %s1232_s1 }
  0x11   : > { %p966_p11 = pnand %p649_p9, %p1235_p1 }
  0x13   : > { %p721_p13 = pneg %p966_p11 }
  0x15   : > { %p722_p0 = pnand %p721_p13, %p720_p12 }
  0x17   : > { %p723_p3 = pneg %p722_p0 }
  0x19   : > { %p728_p7 = pnand %p726_p5, %p723_p3 }
  0x1b   : > { %731 = shalt.err (!%p728_p7)
}
  0x1c   : > { %s732_s6 = scalar_lea.vmem %s959_s22, 256  ;;  %p740_p2 = scmp.lt.s32.totalorder %s959_s22, %s959_s22 }
  0x1d   : > { %p733_p9 = scmp.ne.s32.totalorder %s959_s22, %s732_s6  ;;  %p741_p12 = scmp.lt.s32.totalorder %s732_s6, %s732_s6 }
  0x1f   : > { %p735_p10 = pnand %p733_p9, %p721_p13  ;;  %p742_p0 = por %p741_p12, %p740_p2 }
  0x21   : > { %p736_p1 = pneg %p735_p10 }
  0x23   : > { %p743_p6 = pnand %p742_p0, %p736_p1 }
  0x25   : > { %746 = shalt.err (!%p743_p6)
}
  0x26   : > { %s879_s7 = smov 128   ;;  %s880_s8 = smov 8  }
  0x27   : > { %652 = dma.hbm_to_vmem [thread:$0]  (!%p966_p11), %s1232_s1, 256, %s959_s22, [#allocation6], %s879_s7, %s879_s7, %s880_s8  }
  0x28   : > { %s747_s21 = scalar_lea.hbm %s1233_s2, 512 }
  0x29   : > { %p748_p2 = scmp.ne.s32.totalorder %s1233_s2, %s747_s21  ;;  %p754_p10 = scmp.lt.u32.totalorder %s747_s21, %s1233_s2 }
  0x2b   : > { %p750_p1 = pnand %p748_p2, %p721_p13 }
  0x2d   : > { %p751_p6 = pneg %p750_p1 }
  0x2f   : > { %p756_p3 = pnand %p754_p10, %p751_p6 }
  0x31   : > { %759 = shalt.err (!%p756_p3)
}
  0x32   : > { %s760_s22 = scalar_lea.vmem %s970_s25, 512  ;;  %p768_p12 = scmp.lt.s32.totalorder %s970_s25, %s970_s25 }
  0x33   : > { %p761_p5 = scmp.ne.s32.totalorder %s970_s25, %s760_s22  ;;  %p769_p0 = scmp.lt.s32.totalorder %s760_s22, %s760_s22 }
  0x35   : > { %p763_p7 = pnand %p761_p5, %p721_p13  ;;  %p770_p2 = por %p769_p0, %p768_p12 }
  0x37   : > { %p764_p9 = pneg %p763_p7 }
  0x39   : > { %p771_p1 = pnand %p770_p2, %p764_p9 }
  0x3b   : > { %774 = shalt.err (!%p771_p1)
}
  0x3c   : > { %s881_s29 = smov 256   ;;  %s882_s30 = smov 16  }
  0x3d   : > { %655 = dma.hbm_to_vmem [thread:$0]  (!%p966_p11), %s1233_s2, 512, %s970_s25, [#allocation6], %s881_s29, %s881_s29, %s882_s30  }
  0x3e   : > { %s1025_s6 = sadd.s32 1, %s875_s15   ;;  %s27_s8 = sadd.s32 1, %s871_s14 }
  0x3f   : > { %s24_s7 = ssub.s32 %s875_s15, %s1025_s6  ;;  %p34_p6 = scmp.ne.s32.totalorder %s871_s14, %s867_s13 }
  0x40   : > { %p25_p13 = scmp.eq.s32.totalorder %s24_s7, 0  ;;  %p35_p10 = scmp.eq.s32.totalorder %s875_s15, 0 }
  0x41   : > { %p1242_p5 = scmp.eq.s32.totalorder %s936_s16, 1  ;;  %p666_p9 = scmp.lt.s32.totalorder %s875_s15, 2 }
  0x42   : > { %s1034_s9 = scalar_select %p25_p13, %s871_s14, %s27_s8  }
  0x43   : > { %p36_p3 = por %p35_p10, %p34_p6  ;;  %p1038_p7 = por %p1242_p5, %p34_p6 }
  0x44   : > { %s158_s23 = sand.u32 1, %s871_s14   ;;  %s621_s25 = sshll.u32 %s875_s15, 7 }
  0x45   : > { %s1243_s10 = scalar_select %p1038_p7, 1, 0 }
  0x46   : > { %s602_s11 = sshll.u32 %s158_s23, 3  ;;  %s1048_s24 = scalar_lea.hbm %s1231_s0, %s621_s25 }
  0x47   : > { %s162_s26 = scalar_lea.vmem [#allocation2], %s602_s11  ;;  %p1052_p11 = pnand %p666_p9, %p36_p3 }
  0x48   : > { %s170_s27 = sshll.u32 %s162_s26, 4  ;;  %s159_s22 = scalar_lea.sflag [#allocation3], %s158_s23  ;;  %s1050_s27 = int_to_ptr.vmem [resolvable:$true] %s170_s27 }
  0x49   : > { %s775_s29 = scalar_lea.hbm %s1048_s24, 128  ;;  %p777_p0 = pneg %p1052_p11 }
  0x4a   : > { %p776_p12 = scmp.ne.s32.totalorder %s1048_s24, %s775_s29  ;;  %s780_s5 = scalar_lea.hbm %s1231_s0, 256 }
  0x4b   : > { %p781_p13 = scmp.lt.u32.totalorder %s1048_s24, %s1231_s0  ;;  %p782_p6 = scmp.lt.u32.totalorder %s780_s5, %s775_s29 }
  0x4c   : > { %p778_p2 = pnand %p777_p0, %p776_p12  ;;  %p784_p3 = scmp.lt.u32.totalorder %s775_s29, %s1048_s24 }
  0x4d   : > { %p783_p10 = por %p782_p6, %p781_p13 }
  0x4e   : > { %p779_p1 = pneg %p778_p2 }
  0x4f   : > { %p785_p5 = por %p784_p3, %p783_p10 }
  0x51   : > { %p786_p9 = pnand %p785_p5, %p779_p1 }
  0x53   : > { %789 = shalt.err (!%p786_p9)
}
  0x54   : > { %s790_s23 = scalar_lea.vmem %s1050_s27, 128  ;;  %s883_s11 = smov [#allocation2]  }
  0x55   : > { %p791_p12 = scmp.ne.s32.totalorder %s1050_s27, %s790_s23  ;;  %s795_s25 = sshll.u32 %s883_s11, 4  ;;  %s796_s25 = int_to_ptr.vmem [resolvable:$false] %s795_s25 }
  0x56   : > { %s797_s17 = scalar_lea.vmem %s796_s25, 256  ;;  %p798_p4 = scmp.lt.s32.totalorder %s1050_s27, %s796_s25 }
  0x57   : > { %p793_p2 = pnand %p791_p12, %p777_p0  ;;  %p799_p13 = scmp.lt.s32.totalorder %s797_s17, %s790_s23 }
  0x59   : > { %p794_p7 = pneg %p793_p2  ;;  %p800_p6 = por %p799_p13, %p798_p4 }
  0x5b   : > { %p801_p10 = pnand %p800_p6, %p794_p7 }
  0x5d   : > { %804 = shalt.err (!%p801_p10)
}
  0x5e   : > { %659 = dma.hbm_to_vmem [thread:$0]  (!%p1052_p11), %s1048_s24, 128, %s1050_s27, %s159_s22  }
  0x5f   : > { %179 = sbr.rel (%p955_p8) target bundleno = 486 (0x1e6), region = 32  ;;  %s1084_s21 = sand.u32 (!%p955_p8), 1, %s867_s13  }
  0x60   : > { %s606_s26 = sshll.u32 (!%p955_p8), %s1084_s21, 3  ;;  %s182_s29 = scalar_lea.sflag (!%p955_p8), [#allocation3], %s1084_s21 }
  0x61   : > { %s185_s30 = scalar_lea.vmem (!%p955_p8), [#allocation2], %s606_s26  ;;  %p1245_p4 = scmp.ne.s32.totalorder (!%p955_p8), %s1238_s18, 0 }
  0x66   : > { %850 = dma.done.wait (%p1245_p4), %s182_s29, 128  }
  0x67   : > { %852 = vsyncadd (%p1245_p4), %s182_s29, 4294967168  ;;  %p1246_p7 = scmp.eq.s32.totalorder %s936_s16, 0 }
  0x69   : > { %854 = dma.done.wait (%p1246_p7), [#allocation6], 768   ;;  %p1247_p11 = pmov %p1246_p7 }
  0x6a   : > { %v1096_v0 = vld [vmem:[%s185_s30] sm:$0xff]  ;;  %s884_s20 = smov 1   ;;  %s885_s24 = smov 16   ;;  %v890_v2 = vmov 0.0   ;;  %v228_v3 = vlaneseq  ;;  %vm386_vm4 = vcmask 1043456   ;;  %vm397_vm9 = vcmask 293888  }
  0x6b   : > { %856 = vsyncadd (%p1247_p11), [#allocation6], 4294966528  ;;  %277 = vrot.lane.b32.xlu1 %v1096_v0, %s884_s20  ;;  %243 = vrot.lane.b32.xlu0 %v1096_v0, %s885_s24  ;;  %v1103_v1 = vcombine.high %v1096_v0, %v1096_v0  ;;  %s886_s18 = smov 17   ;;  %s887_s27 = smov 15   ;;  %v1125_v9 = vld [vmem:[#allocation7] sm:$0xff]  ;;  %v1127_v10 = vld [vmem:[#allocation7 + $0x8] sm:$0xff] }
  0x6c   : > { %s888_s28 = smov 127   ;;  %s889_s22 = smov 112   ;;  %474 = vmatprep.mubr.f32.mxu0 %v890_v2  ;;  %480 = vmatprep.mubr.f32.mxu1 %v890_v2  ;;  %v1120_v4 = vshrl.u32 %v228_v3, 7  ;;  %v1122_v5 = vand.u32 127, %v228_v3 }
  0x6d   : > { %s891_s4 = smov 113   ;;  %s892_s5 = smov 111  }
  0x6e   : > { %v286_v8 = vsub.s32 3, %v1120_v4  ;;  %v252_v11 = vsub.s32 1, %v1120_v4  ;;  %vm281_vm0 = vcmp.lt.s32.totalorder %v1122_v5, 1  ;;  %v235_v14 = vsub.s32 0, %v1120_v4  ;;  %s609_s7 = sshll.u32 %s1084_s21, 5  ;;  %s622_s11 = sshll.u32 %s936_s16, 9 }
  0x6f   : > { %224 = vrot.lane.b32.xlu0 %v1096_v0, %s886_s18  ;;  %279 = vrot.lane.b32.xlu1 %v1103_v1, %s884_s20  ;;  %vm247_vm1 = vcmp.lt.s32.totalorder %v1122_v5, 16  ;;  %v269_v17 = vsub.s32 2, %v1120_v4  ;;  %vm230_vm2 = vcmp.lt.s32.totalorder %v1122_v5, 17  ;;  %vm264_vm3 = vcmp.lt.s32.totalorder %v1122_v5, 15  ;;  %s215_s8 = scalar_lea.vmem [#allocation8], %s609_s7  ;;  %s1186_s26 = scalar_lea.hbm %s1234_s3, %s622_s11 }
  0x70   : > { %v287_v15 = vrot.slane %v1125_v9, %v286_v8  ;;  %v291_v16 = vrot.slane %v1127_v10, %v286_v8  ;;  %v253_v20 = vrot.slane %v1125_v9, %v252_v11  ;;  %v257_v21 = vrot.slane %v1127_v10, %v252_v11  ;;  %s505_s23 = sshll.u32 %s215_s8, 4  ;;  %s492_s29 = scalar_lea.sflag [#allocation4], %s1084_s21  ;;  %s1181_s23 = int_to_ptr.vmem [resolvable:$true] %s505_s23 }
  0x71   : > { %v236_v22 = vrot.slane %v1125_v9, %v235_v14  ;;  %v240_v23 = vrot.slane %v1127_v10, %v235_v14  ;;  %v270_v32 = vrot.slane %v1125_v9, %v269_v17  ;;  %v274_v33 = vrot.slane %v1127_v10, %v269_v17  ;;  %s805_s16 = scalar_lea.vmem %s1181_s23, 512  ;;  %p1248_p0 = scmp.ne.s32.totalorder %s1243_s10, 0 }
  0x72   : > { %v303_v36 = vsub.s32 5, %v1120_v4  ;;  %vm298_vm5 = vcmp.lt.s32.totalorder %v1122_v5, 127  ;;  %v337_v41 = vsub.s32 7, %v1120_v4  ;;  %vm332_vm6 = vcmp.lt.s32.totalorder %v1122_v5, 112  ;;  %p806_p8 = scmp.ne.s32.totalorder %s1181_s23, %s805_s16  ;;  %s893_s30 = smov [#allocation8]  }
  0x73   : > { %226 = vrot.lane.b32.xlu1 %v1103_v1, %s886_s18  ;;  %245 = vrot.lane.b32.xlu0 %v1103_v1, %s885_s24  ;;  %v320_v2 = vsub.s32 6, %v1120_v4  ;;  %vm315_vm7 = vcmp.lt.s32.totalorder %v1122_v5, 113  ;;  %vm349_vm8 = vcmp.lt.s32.totalorder %v1122_v5, 111  ;;  %s809_s20 = sshll.u32 %s893_s30, 4  ;;  %s810_s20 = int_to_ptr.vmem [resolvable:$false] %s809_s20 }
  0x74   : > { %v304_v50 = vrot.slane %v1125_v9, %v303_v36  ;;  %v308_v51 = vrot.slane %v1127_v10, %v303_v36  ;;  %v338_v62 = vrot.slane %v1125_v9, %v337_v41  ;;  %v342_v63 = vrot.slane %v1127_v10, %v337_v41  ;;  %p807_p1 = pnand %p806_p8, %p1248_p0  ;;  %s811_s18 = scalar_lea.vmem %s810_s20, 1024 }
  0x75   : > { %p812_p5 = scmp.lt.s32.totalorder %s1181_s23, %s810_s20  ;;  %p813_p9 = scmp.lt.s32.totalorder %s811_s18, %s805_s16 }
  0x76   : > { %p808_p3 = pneg %p807_p1 }
  0x77   : > { %262 = vrot.lane.b32.xlu1 %v1103_v1, %s887_s27  ;;  %260 = vrot.lane.b32.xlu0 %v1096_v0, %s887_s27  ;;  %p814_p12 = por %p813_p9, %p812_p5 }
  0x79   : > { %p815_p2 = pnand %p814_p12, %p808_p3 }
  0x7b   : > { %296 = vrot.lane.b32.xlu1 %v1103_v1, %s888_s28  ;;  %294 = vrot.lane.b32.xlu0 %v1096_v0, %s888_s28 }
  0x7f   : > { %330 = vrot.lane.b32.xlu1 %v1103_v1, %s889_s22  ;;  %328 = vrot.lane.b32.xlu0 %v1096_v0, %s889_s22 }
  0x83   : > { %313 = vrot.lane.b32.xlu1 %v1103_v1, %s891_s4  ;;  %311 = vrot.lane.b32.xlu0 %v1096_v0, %s891_s4 }
  0x87   : > { %347 = vrot.lane.b32.xlu1 %v1103_v1, %s892_s5  ;;  %345 = vrot.lane.b32.xlu0 %v1096_v0, %s892_s5 }
  0xdd   : > { %v278_v6 = vpop.permute.xlu1 %277  ;;  %v244_v7 = vpop.permute.xlu0 %243 }
  0xe1   : > { %v225_v12 = vpop.permute.xlu0 %224  ;;  %v280_v13 = vpop.permute.xlu1 %279 }
  0xe2   : > { %v282_v18 = vsel %vm281_vm0, %v278_v6, %v280_v13  ;;  %v283_v19 = vsel %vm281_vm0, %v280_v13, %v278_v6 }
  0xe3   : > { %v292_v26 = vmul.f32 %v287_v15, %v283_v19  ;;  %v293_v27 = vmul.f32 %v291_v16, %v282_v18  ;;  %v321_v15 = vrot.slane %v1125_v9, %v320_v2  ;;  %v325_v16 = vrot.slane %v1127_v10, %v320_v2 }
  0xe5   : > { %v227_v24 = vpop.permute.xlu1 %226  ;;  %v246_v25 = vpop.permute.xlu0 %245  ;;  %v370_v42 = vrot.slane %v292_v26, 4  ;;  %v371_v43 = vrot.slane %v293_v27, 4  ;;  %v611_v26 = vld [vmem:[#allocation7 + $0x18] ss:$0 sm:$0xff] }
  0xe6   : > { %v248_v28 = vsel %vm247_vm1, %v244_v7, %v246_v25  ;;  %v249_v29 = vsel %vm247_vm1, %v246_v25, %v244_v7  ;;  %v231_v34 = vsel %vm230_vm2, %v225_v12, %v227_v24  ;;  %v232_v35 = vsel %vm230_vm2, %v227_v24, %v225_v12 }
  0xe7   : > { %v258_v30 = vmul.f32 %v253_v20, %v249_v29  ;;  %v259_v31 = vmul.f32 %v257_v21, %v248_v28  ;;  %v241_v46 = vmul.f32 %v236_v22, %v232_v35  ;;  %v242_v47 = vmul.f32 %v240_v23, %v231_v34 }
  0xe9   : > { %v364_v37 = vrot.slane %v258_v30, 4  ;;  %v365_v38 = vrot.slane %v259_v31, 4  ;;  %v263_v39 = vpop.permute.xlu1 %262  ;;  %v261_v40 = vpop.permute.xlu0 %260 }
  0xea   : > { %v265_v44 = vsel %vm264_vm3, %v261_v40, %v263_v39  ;;  %v266_v45 = vsel %vm264_vm3, %v263_v39, %v261_v40 }
  0xeb   : > { %v275_v48 = vmul.f32 %v270_v32, %v266_v45  ;;  %v276_v49 = vmul.f32 %v274_v33, %v265_v44  ;;  %v388_v54 = vsel %vm386_vm4, %v242_v47, %v365_v38  ;;  %v387_v56 = vsel %vm386_vm4, %v241_v46, %v364_v37  ;;  %v610_v32 = vld [vmem:[#allocation7 + $0x10] ss:$0 sm:$0xff] }
  0xed   : > { %v297_v52 = vpop.permute.xlu1 %296  ;;  %v295_v53 = vpop.permute.xlu0 %294  ;;  %v390_v55 = vsel %vm386_vm4, %v276_v49, %v371_v43  ;;  %v389_v57 = vsel %vm386_vm4, %v275_v48, %v370_v42 }
  0xee   : > { %v299_v58 = vsel %vm298_vm5, %v295_v53, %v297_v52  ;;  %v300_v59 = vsel %vm298_vm5, %v297_v52, %v295_v53  ;;  %v623_v60 = vpack.c.bf16 %v390_v55, %v388_v54  ;;  %v625_v61 = vpack.c.bf16 %v389_v57, %v387_v56 }
  0xef   : > { %v309_v3 = vmul.f32 %v304_v50, %v299_v58  ;;  %v310_v6 = vmul.f32 %v308_v51, %v300_v59 }
  0xf0   : > { %624 = vmatprep.subr.bf16.mxu0 %v623_v60  ;;  %631 = vmatprep.subr.bf16.mxu1 %v623_v60 }
  0xf1   : > { %v331_v7 = vpop.permute.xlu1 %330  ;;  %626 = vmatpush1.bf16.msra.mxu0 %v625_v61  ;;  %634 = vmatpush1.bf16.msra.mxu1 %v625_v61  ;;  %v329_v8 = vpop.permute.xlu0 %328  ;;  %v376_v17 = vrot.slane %v309_v3, 4  ;;  %v377_v4 = vrot.slane %v310_v6, 4 }
  0xf2   : > { %v333_v11 = vsel %vm332_vm6, %v329_v8, %v331_v7  ;;  %v334_v12 = vsel %vm332_vm6, %v331_v7, %v329_v8 }
  0xf3   : > { %v343_v13 = vmul.f32 %v338_v62, %v333_v11  ;;  %v344_v14 = vmul.f32 %v342_v63, %v334_v12  ;;  %v392_v28 = vsel %vm386_vm4, %v1103_v1, %v377_v4  ;;  %v391_v29 = vsel %vm386_vm4, %v1096_v0, %v376_v17  ;;  %v395_v0 = vld [vmem:[#allocation5] sm:$0xff]  ;;  %v396_v1 = vld [vmem:[#allocation5 + $0x8] sm:$0xff] }
  0xf5   : > { %v314_v18 = vpop.permute.xlu1 %313  ;;  %v312_v19 = vpop.permute.xlu0 %311  ;;  %v382_v22 = vrot.slane %v343_v13, 4  ;;  %v383_v23 = vrot.slane %v344_v14, 4 }
  0xf6   : > { %v316_v20 = vsel %vm315_vm7, %v312_v19, %v314_v18  ;;  %v317_v21 = vsel %vm315_vm7, %v314_v18, %v312_v19 }
  0xf7   : > { %v326_v24 = vmul.f32 %v321_v15, %v316_v20  ;;  %v327_v25 = vmul.f32 %v325_v16, %v317_v21 }
  0xf9   : > { %v348_v27 = vpop.permute.xlu1 %347  ;;  %v394_v9 = vsel %vm386_vm4, %v327_v25, %v383_v23  ;;  %v346_v10 = vpop.permute.xlu0 %345  ;;  %v393_v30 = vsel %vm386_vm4, %v326_v24, %v382_v22 }
  0xfa   : > { %v627_v31 = vpack.c.bf16 %v394_v9, %v392_v28  ;;  %v350_v5 = vsel %vm349_vm8, %v346_v10, %v348_v27  ;;  %v351_v33 = vsel %vm349_vm8, %v348_v27, %v346_v10  ;;  %v629_v34 = vpack.c.bf16 %v393_v30, %v391_v29 }
  0xfb   : > { %v361_v35 = vmul.f32 %v611_v26, %v351_v33  ;;  %v360_v36 = vmul.f32 %v610_v32, %v350_v5 }
  0xfc   : > { %628 = vmatprep.subr.bf16.mxu0 %v627_v31  ;;  %632 = vmatprep.subr.bf16.mxu1 %v627_v31 }
  0xfd   : > { %630 = vmatpush1.bf16.msra.mxu0 %v629_v34  ;;  %635 = vmatpush1.bf16.msra.mxu1 %v629_v34 }
  0xfe   : > { %612 = vmatprep.subr.msk.mxu0 %vm386_vm4, %v361_v35  ;;  %633 = vmatprep.subr.msk.mxu1 %vm386_vm4, %v361_v35 }
 0x101   : > { %613 = vmatpush1.msk.msra.mxu0 %vm386_vm4, %v360_v36  ;;  %636 = vmatpush1.msk.msra.mxu1 %vm386_vm4, %v360_v36 }
 0x102   : > { %614 = vmatmul.mubr.msk.f32.vlgmr.msra.gmra.mrb[0].mxu0 %vm397_vm9, %v395_v0  ;;  %615 = vmatmul.mubr.msk.f32.vlgmr.msra.gmra.mrb[0].mxu1 %vm397_vm9, %v396_v1 }
 0x1d5   : > { %v476_v37 = vpop.f32.mrb[0].mxu0  ;;  %v482_v38 = vpop.f32.mrb[0].mxu1 }
 0x1d6   : > { %487 = vst [vmem:[%s215_s8] sm:$0xff] %v476_v37  ;;  %489 = vst [vmem:[%s215_s8 + $0x10] sm:$0xff] %v482_v38  ;;  %v478_v39 = vpop.f32.mrb[1].mxu0  ;;  %v484_v40 = vpop.f32.mrb[1].mxu1 }
 0x1d7   : > { %488 = vst [vmem:[%s215_s8 + $0x8] sm:$0xff] %v478_v39  ;;  %490 = vst [vmem:[%s215_s8 + $0x18] sm:$0xff] %v484_v40 }
 0x1d8   : > { %818 = shalt.err (!%p815_p2)
}
 0x1d9   : > { %s819_s27 = scalar_lea.hbm %s1186_s26, 512  ;;  %s823_s4 = scalar_lea.hbm %s1234_s3, 1024 }
 0x1da   : > { %p820_p13 = scmp.ne.s32.totalorder %s1186_s26, %s819_s27  ;;  %p824_p4 = scmp.lt.u32.totalorder %s1186_s26, %s1234_s3 }
 0x1db   : > { %p825_p7 = scmp.lt.u32.totalorder %s823_s4, %s819_s27  ;;  %p827_p8 = scmp.lt.u32.totalorder %s819_s27, %s1186_s26 }
 0x1dc   : > { %p821_p6 = pnand %p820_p13, %p1248_p0 }
 0x1dd   : > { %p826_p11 = por %p825_p7, %p824_p4 }
 0x1de   : > { %p822_p10 = pneg %p821_p6 }
 0x1df   : > { %p828_p1 = por %p827_p8, %p826_p11 }
 0x1e1   : > { %p829_p3 = pnand %p828_p1, %p822_p10 }
 0x1e3   : > { %832 = shalt.err (!%p829_p3)
}
 0x1e4   : > { %s894_s8 = smov 256  }
 0x1e5   : > { %647 = dma.vmem_to_hbm [thread:$0]  (%p1248_p0), %s1181_s23, 512, %s1186_s26, %s492_s29, %s894_s8, %s894_s8, %s885_s24  }
 0x1e6 PF: > { %s520_s11 = sand.u32 1, %s863_s12   ;;  %p1249_p5 = scmp.ne.s32.totalorder %s1239_s19, 0 }
 0x1e7   : > { %p1250_p9 = scmp.ge.s32.totalorder %s875_s15, 2  ;;  %s521_s25 = scalar_lea.sflag [#allocation4], %s520_s11 }
 0x1e9   : > { %p661_p12 = pnand %p1250_p9, %p1249_p5 }
 0x1eb   : > { %858 = dma.done.wait (!%p661_p12), %s521_s25, 512  }
 0x1ec   : > { %860 = vsyncadd (!%p661_p12), %s521_s25, 4294966784  ;;  %p17_p2 = scmp.ge.s32.totalorder %s1025_s6, 4   ;;  %s1251_s12 = smov %s867_s13 }
 0x1ed   : > { %s1252_s13 = smov %s871_s14  ;;  %s1253_s14 = smov %s1034_s9 }
 0x1ee   : > { %s1254_s15 = smov %s1025_s6  ;;  %19 = sbr.rel (!%p17_p2) target bundleno = 6 (0x6), region = 85 }
 0x1f5   :  { %526 = vsyncpa [#allocation3], 1 }
 0x1f6   :  { %528 = vsyncpa [#allocation3 + $0x1], 1 }
 0x1f7   :  { %529 = vsyncpa [#allocation6], 1 }
 0x1f8   :  { %530 = vsyncpa [#allocation4], 1 }
 0x1f9   :  { %532 = vsyncpa [#allocation4 + $0x1], 1 }

</bundles_post_ra>
